<compile_context>
chip_gen: v7x
topology: tpu7x:2x2x1
jax: 0.10.0
libtpu: 0.0.40
codegen_flags: <defaults>
</compile_context>

<pallas_src>
import functools
import math

import jax
import jax.numpy as jnp
from jax.experimental import pallas as pl
from jax.experimental.pallas import tpu as pltpu

_BF16 = jnp.bfloat16
_F32 = jnp.float32

_PARALLEL = pltpu.PARALLEL
_ARBITRARY = pltpu.ARBITRARY
_CORE_PARALLEL = getattr(pltpu, "CORE_PARALLEL", _PARALLEL)

# Headroom for resident bf16 weights + pipelined activation tiles; stays well
# under v7x's 64 MiB physical VMEM while lifting v5e's 16 MiB scoped default.
_LINEAR_VMEM_LIMIT = 48 * 1024 * 1024


# ------------------------------- small utils ------------------------------- #

def _lead_semantics(size):
    # Request a cross-TensorCore split of the leading axis only when it divides
    # evenly on a 2-core (v7x) chip; harmless on single-core chips.
    return _CORE_PARALLEL if (size > 1 and size % 2 == 0) else _PARALLEL


def _resident_spec(block_shape, index_map):
    """BlockSpec for a block whose index is constant over the grid: single
    buffer it so the resident weight is not allocated twice in VMEM."""
    try:
        return pl.BlockSpec(block_shape, index_map, pipeline_mode=pl.Buffered(1))
    except (TypeError, AttributeError):
        return pl.BlockSpec(block_shape, index_map)


def _tile_and_pad(n, target):
    """Pick a tile size <= target (multiple of 8) plus the padded extent it
    divides.  Never falls back to a full-length block for large n (which could
    silently blow VMEM, especially on v7x's 64 MiB)."""
    target = max(8, target - target % 8)
    if n <= target:
        return n, n
    if n % target == 0:
        return target, n
    return target, ((n + target - 1) // target) * target


def _pad_dim(a, axis, new_len):
    if a.shape[axis] == new_len:
        return a
    pad = [(0, 0)] * a.ndim
    pad[axis] = (0, new_len - a.shape[axis])
    return jnp.pad(a, pad)


# ----------------------------- Linear kernels ------------------------------ #

def _linear_kernel(x_ref, w_ref, b_ref, o_ref):
    x = x_ref[...].astype(_BF16)                        # bf16 into the MXU
    acc = jnp.dot(x, w_ref[...], preferred_element_type=_F32)
    o_ref[...] = (acc + b_ref[...]).astype(o_ref.dtype)


def pallas_linear(x2d, w, b, *, out_dtype, block_m=256):
    """out = x2d @ w + b, tiled over rows; the bf16 weight stays resident."""
    M, K = x2d.shape
    n_out = w.shape[1]
    bm, m_pad = _tile_and_pad(M, block_m)
    xp = _pad_dim(x2d, 0, m_pad)
    steps = m_pad // bm
    cost = pl.CostEstimate(
        flops=2 * M * K * n_out, transcendentals=0,
        bytes_accessed=(x2d.dtype.itemsize * M * K + w.dtype.itemsize * K * n_out
                        + jnp.dtype(out_dtype).itemsize * M * n_out + 4 * n_out))
    out = pl.pallas_call(
        _linear_kernel,
        out_shape=jax.ShapeDtypeStruct((m_pad, n_out), out_dtype),
        grid=(steps,),
        in_specs=[
            pl.BlockSpec((bm, K), lambda i: (i, 0)),
            _resident_spec((K, n_out), lambda i: (0, 0)),
            _resident_spec((1, n_out), lambda i: (0, 0)),
        ],
        out_specs=pl.BlockSpec((bm, n_out), lambda i: (i, 0)),
        compiler_params=pltpu.CompilerParams(
            dimension_semantics=(_lead_semantics(steps),),
            vmem_limit_bytes=_LINEAR_VMEM_LIMIT),
        cost_estimate=cost,
    )(xp, w, b.reshape(1, n_out))
    return out[:M] if m_pad != M else out


def _qkv_linear_kernel(x_ref, wq_ref, wk_ref, wv_ref, bq_ref, bk_ref, bv_ref,
                       q_ref, k_ref, v_ref):
    x = x_ref[...].astype(_BF16)
    for w_ref, b_ref, o_ref in ((wq_ref, bq_ref, q_ref),
                                (wk_ref, bk_ref, k_ref),
                                (wv_ref, bv_ref, v_ref)):
        acc = jnp.dot(x, w_ref[...], preferred_element_type=_F32)
        o_ref[...] = (acc + b_ref[...]).astype(o_ref.dtype)


def pallas_qkv_linear(x2d, wq, wk, wv, bq, bk, bv, *, out_dtype=_BF16,
                      block_m=256):
    """Fused QKV projection: x is read once, the three bf16 (K, C) weights stay
    resident (single-buffered), q/k/v are emitted as three channel-packed
    outputs so attention can consume them without any XLA transpose."""
    M, K = x2d.shape
    C = wq.shape[1]
    bm, m_pad = _tile_and_pad(M, block_m)
    xp = _pad_dim(x2d, 0, m_pad)
    steps = m_pad // bm
    cost = pl.CostEstimate(
        flops=2 * M * K * 3 * C, transcendentals=0,
        bytes_accessed=(x2d.dtype.itemsize * M * K + 3 * wq.dtype.itemsize * K * C
                        + 3 * jnp.dtype(out_dtype).itemsize * M * C + 12 * C))
    outs = pl.pallas_call(
        _qkv_linear_kernel,
        out_shape=tuple(jax.ShapeDtypeStruct((m_pad, C), out_dtype)
                        for _ in range(3)),
        grid=(steps,),
        in_specs=[
            pl.BlockSpec((bm, K), lambda i: (i, 0)),
            _resident_spec((K, C), lambda i: (0, 0)),
            _resident_spec((K, C), lambda i: (0, 0)),
            _resident_spec((K, C), lambda i: (0, 0)),
            _resident_spec((1, C), lambda i: (0, 0)),
            _resident_spec((1, C), lambda i: (0, 0)),
            _resident_spec((1, C), lambda i: (0, 0)),
        ],
        out_specs=tuple(pl.BlockSpec((bm, C), lambda i: (i, 0))
                        for _ in range(3)),
        compiler_params=pltpu.CompilerParams(
            dimension_semantics=(_lead_semantics(steps),),
            vmem_limit_bytes=_LINEAR_VMEM_LIMIT),
        cost_estimate=cost,
    )(xp, wq, wk, wv, bq.reshape(1, C), bk.reshape(1, C), bv.reshape(1, C))
    if m_pad != M:
        outs = tuple(o[:M] for o in outs)
    return outs


# ------------------------- Flash attention kernels ------------------------- #

def _init_state(m_ref, l_ref, acc_ref, qs_ref, q_ref, scale):
    m_ref[...] = jnp.full(m_ref.shape, -jnp.inf, dtype=m_ref.dtype)
    l_ref[...] = jnp.zeros(l_ref.shape, l_ref.dtype)
    acc_ref[...] = jnp.zeros(acc_ref.shape, acc_ref.dtype)
    # q*scale hoisted out of the KV loop (the q block is resident across ki).
    qs_ref[...] = (q_ref[0].astype(_F32) * scale).astype(qs_ref.dtype)


def _attend_heads(qs, k, v, m_ref, l_ref, acc_ref, *, heads, head_dim, mask):
    """Online-softmax update of all heads against one (tk, C) K/V tile.
    qs/k/v are channel-packed bf16; m/l are (tq, heads) fp32 scratch columns
    and acc is a (tq, heads*head_dim) fp32 scratch."""
    for h in range(heads):
        sl = slice(h * head_dim, (h + 1) * head_dim)
        # Contract on head_dim of both operands: no k.T relayout in VMEM.
        s = jax.lax.dot_general(qs[:, sl], k[:, sl], (((1,), (1,)), ((), ())),
                                preferred_element_type=_F32)      # (tq, tk)
        if mask is not None:
            s = jnp.where(mask, s, -jnp.inf)
        m_prev = m_ref[:, h:h + 1]
        m_new = jnp.maximum(m_prev, jnp.max(s, axis=-1, keepdims=True))
        alpha = jnp.exp(m_prev - m_new)                            # (tq, 1) fp32
        p = jnp.exp((s - m_new).astype(_BF16))    # bf16 exp on the EUP; p feeds bf16 MXU
        l_ref[:, h:h + 1] = alpha * l_ref[:, h:h + 1] + jnp.sum(
            p.astype(_F32), axis=-1, keepdims=True)
        pv = jax.lax.dot_general(p, v[:, sl], (((1,), (0,)), ((), ())),
                                 preferred_element_type=_F32)      # (tq, D)
        acc_ref[:, sl] = alpha * acc_ref[:, sl] + pv
        m_ref[:, h:h + 1] = m_new


def _finalize_heads(o_ref, l_ref, acc_ref, *, heads, head_dim):
    for h in range(heads):
        sl = slice(h * head_dim, (h + 1) * head_dim)
        l_h = l_ref[:, h:h + 1]
        inv = pl.reciprocal(l_h, approx=True)        # EUP slot (nearly free)
        inv = inv * (2.0 - l_h * inv)                # one Newton step on (tq, 1)
        o_ref[0, :, sl] = (acc_ref[:, sl] * inv).astype(o_ref.dtype)


def _flash_kernel(q_ref, k_ref, v_ref, o_ref, m_ref, l_ref, acc_ref, qs_ref, *,
                  scale, causal, heads, head_dim, q_tile, kv_tile, kv_len,
                  kv_pad):
    qi = pl.program_id(1)
    ki = pl.program_id(2)

    @pl.when(ki == 0)
    def _():
        _init_state(m_ref, l_ref, acc_ref, qs_ref, q_ref, scale)

    def compute():
        k = k_ref[0].astype(_BF16)
        v = v_ref[0].astype(_BF16)
        mask = None
        if causal or kv_pad != kv_len:
            col = jax.lax.broadcasted_iota(jnp.int32, (q_tile, kv_tile), 1) \
                + ki * kv_tile
            if kv_pad != kv_len:
                mask = col < kv_len
            if causal:
                row = jax.lax.broadcasted_iota(jnp.int32, (q_tile, kv_tile), 0) \
                    + qi * q_tile
                cm = col <= row
                mask = cm if mask is None else (mask & cm)
        _attend_heads(qs_ref[...], k, v, m_ref, l_ref, acc_ref,
                      heads=heads, head_dim=head_dim, mask=mask)

    if causal:
        # Tiles entirely above the diagonal: compute skipped here; their HBM
        # DMAs are elided by the clamped K/V index_map in the wrapper.
        pl.when(ki * kv_tile < (qi + 1) * q_tile)(compute)
    else:
        compute()

    @pl.when(ki == pl.num_programs(2) - 1)
    def _():
        _finalize_heads(o_ref, l_ref, acc_ref, heads=heads, head_dim=head_dim)


def pallas_flash_attention(q, k, v, scale, *, num_heads, causal=False,
                           q_block=512, kv_block=256):
    """q, k, v: (B, Nq|Nk, C) channel-packed (C = num_heads * head_dim)."""
    B, Nq, C = q.shape
    Nk = k.shape[1]
    head_dim = C // num_heads
    assert head_dim * num_heads == C
    tq, nq_pad = _tile_and_pad(Nq, q_block)
    tk, nk_pad = _tile_and_pad(Nk, kv_block)
    q = _pad_dim(q, 1, nq_pad)
    k = _pad_dim(k, 1, nk_pad)
    v = _pad_dim(v, 1, nk_pad)
    nq, nk = nq_pad // tq, nk_pad // tk

    if causal:
        # Clamp so KV tiles above the diagonal reuse the previous block index
        # and their HBM DMAs are elided, not just their compute.
        def kv_index(b, qi, ki):
            return (b, jnp.minimum(ki, ((qi + 1) * tq - 1) // tk), 0)
    else:
        def kv_index(b, qi, ki):
            return (b, ki, 0)

    kern = functools.partial(
        _flash_kernel, scale=scale, causal=causal, heads=num_heads,
        head_dim=head_dim, q_tile=tq, kv_tile=tk, kv_len=Nk, kv_pad=nk_pad)
    cost = pl.CostEstimate(
        flops=4 * B * Nq * Nk * C,
        transcendentals=B * num_heads * Nq * Nk,
        bytes_accessed=2 * (2 * B * Nq * C + 2 * B * Nk * C))
    out = pl.pallas_call(
        kern,
        out_shape=jax.ShapeDtypeStruct((B, nq_pad, C), _BF16),
        grid=(B, nq, nk),
        in_specs=[
            pl.BlockSpec((1, tq, C), lambda b, qi, ki: (b, qi, 0)),
            pl.BlockSpec((1, tk, C), kv_index),
            pl.BlockSpec((1, tk, C), kv_index),
        ],
        out_specs=pl.BlockSpec((1, tq, C), lambda b, qi, ki: (b, qi, 0)),
        scratch_shapes=[
            pltpu.VMEM((tq, num_heads), _F32),   # running max per head
            pltpu.VMEM((tq, num_heads), _F32),   # running denom per head
            pltpu.VMEM((tq, C), _F32),           # output accumulator (all heads)
            pltpu.VMEM((tq, C), _BF16),          # q * scale (hoisted)
        ],
        compiler_params=pltpu.CompilerParams(
            dimension_semantics=(_lead_semantics(B), _PARALLEL, _ARBITRARY)),
        cost_estimate=cost,
    )(q, k, v)
    return out[:, :Nq] if nq_pad != Nq else out


def _flash_cache_kernel(q_ref, kc_ref, vc_ref, kn_ref, vn_ref, o_ref,
                        m_ref, l_ref, acc_ref, qs_ref, *,
                        scale, heads, head_dim, q_tile, kv_tile, cache_len,
                        cache_pad):
    ki = pl.program_id(2)

    @pl.when(ki == 0)
    def _():
        _init_state(m_ref, l_ref, acc_ref, qs_ref, q_ref, scale)

    mask = None
    if cache_pad != cache_len:
        col = jax.lax.broadcasted_iota(jnp.int32, (q_tile, kv_tile), 1) \
            + ki * kv_tile
        mask = col < cache_len
    _attend_heads(qs_ref[...], kc_ref[0].astype(_BF16), vc_ref[0].astype(_BF16),
                  m_ref, l_ref, acc_ref, heads=heads, head_dim=head_dim,
                  mask=mask)

    @pl.when(ki == pl.num_programs(2) - 1)
    def _():
        # Fold the freshly computed K/V (resident block) into the online
        # softmax; no HBM concat of cache + new K/V is ever materialized.
        _attend_heads(qs_ref[...], kn_ref[0].astype(_BF16),
                      vn_ref[0].astype(_BF16), m_ref, l_ref, acc_ref,
                      heads=heads, head_dim=head_dim, mask=None)
        _finalize_heads(o_ref, l_ref, acc_ref, heads=heads, head_dim=head_dim)


def pallas_flash_attention_with_cache(q, k_cache, v_cache, k_new, v_new, scale,
                                      *, num_heads, q_block=256, kv_block=2048):
    """q/k_new/v_new: (B, Nq|Nn, C); k_cache/v_cache: (B, Nc, C), Nc > 0."""
    B, Nq, C = q.shape
    Nc = k_cache.shape[1]
    Nn = k_new.shape[1]
    head_dim = C // num_heads
    tq, nq_pad = _tile_and_pad(Nq, q_block)
    tk, nc_pad = _tile_and_pad(Nc, kv_block)
    q = _pad_dim(q, 1, nq_pad)
    k_cache = _pad_dim(k_cache, 1, nc_pad)
    v_cache = _pad_dim(v_cache, 1, nc_pad)
    nq, nk = nq_pad // tq, nc_pad // tk

    kern = functools.partial(
        _flash_cache_kernel, scale=scale, heads=num_heads, head_dim=head_dim,
        q_tile=tq, kv_tile=tk, cache_len=Nc, cache_pad=nc_pad)
    nk_total = Nc + Nn
    cost = pl.CostEstimate(
        flops=4 * B * Nq * nk_total * C,
        transcendentals=B * num_heads * Nq * nk_total,
        bytes_accessed=2 * (2 * B * Nq * C + 2 * B * nk_total * C))
    out = pl.pallas_call(
        kern,
        out_shape=jax.ShapeDtypeStruct((B, nq_pad, C), _BF16),
        grid=(B, nq, nk),
        in_specs=[
            pl.BlockSpec((1, tq, C), lambda b, qi, ki: (b, qi, 0)),
            pl.BlockSpec((1, tk, C), lambda b, qi, ki: (b, ki, 0)),
            pl.BlockSpec((1, tk, C), lambda b, qi, ki: (b, ki, 0)),
            pl.BlockSpec((1, Nn, C), lambda b, qi, ki: (b, 0, 0)),   # resident
            pl.BlockSpec((1, Nn, C), lambda b, qi, ki: (b, 0, 0)),   # resident
        ],
        out_specs=pl.BlockSpec((1, tq, C), lambda b, qi, ki: (b, qi, 0)),
        scratch_shapes=[
            pltpu.VMEM((tq, num_heads), _F32),
            pltpu.VMEM((tq, num_heads), _F32),
            pltpu.VMEM((tq, C), _F32),
            pltpu.VMEM((tq, C), _BF16),
        ],
        compiler_params=pltpu.CompilerParams(
            dimension_semantics=(_lead_semantics(B), _PARALLEL, _ARBITRARY)),
        cost_estimate=cost,
    )(q, k_cache, v_cache, k_new, v_new)
    return out[:, :Nq] if nq_pad != Nq else out


# ------------------------------ Module wrapper ------------------------------ #

class KVCacheAttentionPallas:
    """JAX/Pallas port of opensora KVCacheAttention (default config)."""

    def __init__(self, dim, num_heads=8, qkv_bias=False, is_causal=False,
                 key=jax.random.PRNGKey(0)):
        assert dim % num_heads == 0
        self.dim = dim
        self.num_heads = num_heads
        self.head_dim = dim // num_heads
        self.scale = self.head_dim ** (-0.5)
        self.is_causal = is_causal
        self.is_temporal = is_causal

        k1, k2, k3, k4 = jax.random.split(key, 4)
        bound = 1.0 / math.sqrt(dim)
        w_qkv = jax.random.uniform(k1, (dim, 3 * dim), _F32, -bound, bound)
        b_qkv = (jax.random.uniform(k2, (3 * dim,), _F32, -bound, bound)
                 if qkv_bias else jnp.zeros((3 * dim,), _F32))
        # Weights stored in bf16: halves resident VMEM and HBM traffic; the
        # kernels accumulate in fp32.
        self.w_q = w_qkv[:, :dim].astype(_BF16)
        self.w_k = w_qkv[:, dim:2 * dim].astype(_BF16)
        self.w_v = w_qkv[:, 2 * dim:].astype(_BF16)
        self.b_q = b_qkv[:dim]
        self.b_k = b_qkv[dim:2 * dim]
        self.b_v = b_qkv[2 * dim:]
        self.w_proj = jax.random.uniform(k3, (dim, dim), _F32,
                                         -bound, bound).astype(_BF16)
        self.b_proj = jax.random.uniform(k4, (dim,), _F32, -bound, bound)
        # TODO(synk): qk_norm (LlamaRMSNorm), rope and dropout are Identity /
        # None / 0.0 in the default config and are not implemented here.

    def __call__(self, x, kv_cache=None):
        B, N, C = x.shape
        q, k, v = pallas_qkv_linear(x.reshape(B * N, C), self.w_q, self.w_k,
                                    self.w_v, self.b_q, self.b_k, self.b_v)
        q = q.reshape(B, N, C)
        k = k.reshape(B, N, C)
        v = v.reshape(B, N, C)

        new_cache = None
        if kv_cache is None:
            if self.is_temporal:
                # Cache kept channel-packed (B, N-1, C) == (B, N-1, H*D): same
                # contents as the torch (B, H, N-1, D) cache, laid out so the
                # decode kernel consumes it without a transpose.
                new_cache = (k[:, :-1], v[:, :-1])
            out = pallas_flash_attention(q, k, v, self.scale,
                                         num_heads=self.num_heads,
                                         causal=self.is_causal)
        else:
            k_cache, v_cache = kv_cache
            if k_cache.shape[1] == 0:
                out = pallas_flash_attention(q, k, v, self.scale,
                                             num_heads=self.num_heads,
                                             causal=False)
            else:
                out = pallas_flash_attention_with_cache(
                    q, k_cache, v_cache, k, v, self.scale,
                    num_heads=self.num_heads)
            # TODO(synk): a persistent preallocated cache updated in place via
            # input_output_aliases would avoid reallocating it every step.

        out = pallas_linear(out.reshape(B * N, C), self.w_proj, self.b_proj,
                            out_dtype=x.dtype).reshape(B, N, C)
        if kv_cache is None and self.is_temporal:
            return out, new_cache
        return out


# ------------------------------- Reference --------------------------------- #

def _reference(mod, x, kv_cache=None):
    B, N, C = x.shape
    H, D = mod.num_heads, mod.head_dim
    xf = x.reshape(B * N, C).astype(_F32)

    def lin(w, b):
        return xf @ w.astype(_F32) + b.astype(_F32)

    def heads(t):
        return t.reshape(B, N, H, D).transpose(0, 2, 1, 3)

    q = heads(lin(mod.w_q, mod.b_q))
    k = heads(lin(mod.w_k, mod.b_k))
    v = heads(lin(mod.w_v, mod.b_v))
    causal = mod.is_causal and kv_cache is None
    if kv_cache is not None:
        kc, vc = kv_cache                                   # (B, Nc, C)
        Nc = kc.shape[1]
        kc = kc.astype(_F32).reshape(B, Nc, H, D).transpose(0, 2, 1, 3)
        vc = vc.astype(_F32).reshape(B, Nc, H, D).transpose(0, 2, 1, 3)
        k = jnp.concatenate([kc, k], axis=2)
        v = jnp.concatenate([vc, v], axis=2)
    s = jnp.einsum("bhqd,bhkd->bhqk", q * mod.scale, k)
    if causal:
        mask = jnp.tril(jnp.ones(s.shape[-2:], bool))
        s = jnp.where(mask, s, -jnp.inf)
    p = jax.nn.softmax(s, axis=-1)
    o = jnp.einsum("bhqk,bhkd->bhqd", p, v)
    o = o.transpose(0, 2, 1, 3).reshape(B * N, C)
    return (o @ mod.w_proj.astype(_F32) + mod.b_proj.astype(_F32)).reshape(B, N, C)


if __name__ == "__main__":
    key = jax.random.PRNGKey(0)
    xkey, pkey, x2key = jax.random.split(key, 3)

    B, N, C, H = 2, 8, 32, 8
    x = jax.random.normal(xkey, (B, N, C), jnp.float32)

    # Default (non-causal) module: returns just x.
    mod = KVCacheAttentionPallas(C, H, key=pkey)
    y = mod(x)
    jax.block_until_ready(y)
    ref = _reference(mod, x)
    assert jnp.allclose(y, ref, atol=4e-2, rtol=4e-2), "non-causal mismatch"

    # Temporal (is_causal=True) module: returns (x, kv_cache); feed the cache
    # back in on a new step to exercise the kv_cache (decode) branch.
    mod_t = KVCacheAttentionPallas(C, H, is_causal=True, key=pkey)
    y1, cache = mod_t(x)
    x_step = jax.random.normal(x2key, (B, 1, C), jnp.float32)
    y2 = mod_t(x_step, kv_cache=cache)
    jax.block_until_ready((y1, y2))
    ref1 = _reference(mod_t, x)
    ref2 = _reference(mod_t, x_step, kv_cache=cache)
    assert jnp.allclose(y1, ref1, atol=4e-2, rtol=4e-2), "causal mismatch"
    assert jnp.allclose(y2, ref2, atol=4e-2, rtol=4e-2), "kv_cache mismatch"

    print("KERNEL_OK")
</pallas_src>

<mosaic_0001>
module attributes {stable_mosaic.version = 11 : i64} {
  func.func @_qkv_linear_kernel(%arg0: i32, %arg1: memref<16x32xf32, #tpu.memory_space<vmem>>, %arg2: memref<32x32xbf16, #tpu.memory_space<vmem>>, %arg3: memref<32x32xbf16, #tpu.memory_space<vmem>>, %arg4: memref<32x32xbf16, #tpu.memory_space<vmem>>, %arg5: memref<1x32xf32, #tpu.memory_space<vmem>>, %arg6: memref<1x32xf32, #tpu.memory_space<vmem>>, %arg7: memref<1x32xf32, #tpu.memory_space<vmem>>, %arg8: memref<16x32xbf16, #tpu.memory_space<vmem>>, %arg9: memref<16x32xbf16, #tpu.memory_space<vmem>>, %arg10: memref<16x32xbf16, #tpu.memory_space<vmem>>) attributes {dimension_semantics = [#tpu.dimension_semantics<parallel>], iteration_bounds = array<i64: 1>, scalar_prefetch = 0 : i64, scratch_operands = 0 : i64, tpu.core_type = #tpu.core_type<tc>, window_params = [{transform_indices = @transform_0, window_bounds = array<i64: 16, 32>}, {pipeline_mode = #tpu.pipeline_mode<synchronous>, transform_indices = @transform_1, window_bounds = array<i64: 32, 32>}, {pipeline_mode = #tpu.pipeline_mode<synchronous>, transform_indices = @transform_2, window_bounds = array<i64: 32, 32>}, {pipeline_mode = #tpu.pipeline_mode<synchronous>, transform_indices = @transform_3, window_bounds = array<i64: 32, 32>}, {pipeline_mode = #tpu.pipeline_mode<synchronous>, transform_indices = @transform_4, window_bounds = array<i64: 1, 32>}, {pipeline_mode = #tpu.pipeline_mode<synchronous>, transform_indices = @transform_5, window_bounds = array<i64: 1, 32>}, {pipeline_mode = #tpu.pipeline_mode<synchronous>, transform_indices = @transform_6, window_bounds = array<i64: 1, 32>}, {transform_indices = @transform_7, window_bounds = array<i64: 16, 32>}, {transform_indices = @transform_8, window_bounds = array<i64: 16, 32>}, {transform_indices = @transform_9, window_bounds = array<i64: 16, 32>}]} {
    %c0 = arith.constant 0 : index
    %c0_0 = arith.constant 0 : index
    %0 = vector.load %arg1[%c0, %c0_0] : memref<16x32xf32, #tpu.memory_space<vmem>>, vector<16x32xf32>
    %1 = arith.truncf %0 : vector<16x32xf32> to vector<16x32xbf16>
    %c0_1 = arith.constant 0 : index
    %c0_2 = arith.constant 0 : index
    %2 = vector.load %arg2[%c0_1, %c0_2] : memref<32x32xbf16, #tpu.memory_space<vmem>>, vector<32x32xbf16>
    %cst = arith.constant dense<0.000000e+00> : vector<16x32xf32>
    %3 = tpu.matmul %1, %2, %cst {dimension_numbers = #tpu.dot_dimension_numbers<[1], [0], [0], [1], [0, 0, 1, 1], [], []>} : vector<16x32xbf16>, vector<32x32xbf16>, vector<16x32xf32> -> vector<16x32xf32>
    %c0_3 = arith.constant 0 : index
    %c0_4 = arith.constant 0 : index
    %4 = vector.load %arg5[%c0_3, %c0_4] : memref<1x32xf32, #tpu.memory_space<vmem>>, vector<1x32xf32>
    %5 = vector.broadcast %4 : vector<1x32xf32> to vector<16x32xf32>
    %6 = arith.addf %3, %5 : vector<16x32xf32>
    %7 = arith.truncf %6 : vector<16x32xf32> to vector<16x32xbf16>
    %c0_5 = arith.constant 0 : index
    %c0_6 = arith.constant 0 : index
    %8 = vector.load %arg8[%c0_5, %c0_6] : memref<16x32xbf16, #tpu.memory_space<vmem>>, vector<16x32xbf16>
    tpu.vector_store %arg8[%c0_5, %c0_6], %7 {strides = array<i32>} : memref<16x32xbf16, #tpu.memory_space<vmem>>, vector<16x32xbf16>,
    %c0_7 = arith.constant 0 : index
    %c0_8 = arith.constant 0 : index
    %9 = vector.load %arg3[%c0_7, %c0_8] : memref<32x32xbf16, #tpu.memory_space<vmem>>, vector<32x32xbf16>
    %cst_9 = arith.constant dense<0.000000e+00> : vector<16x32xf32>
    %10 = tpu.matmul %1, %9, %cst_9 {dimension_numbers = #tpu.dot_dimension_numbers<[1], [0], [0], [1], [0, 0, 1, 1], [], []>} : vector<16x32xbf16>, vector<32x32xbf16>, vector<16x32xf32> -> vector<16x32xf32>
    %c0_10 = arith.constant 0 : index
    %c0_11 = arith.constant 0 : index
    %11 = vector.load %arg6[%c0_10, %c0_11] : memref<1x32xf32, #tpu.memory_space<vmem>>, vector<1x32xf32>
    %12 = vector.broadcast %11 : vector<1x32xf32> to vector<16x32xf32>
    %13 = arith.addf %10, %12 : vector<16x32xf32>
    %14 = arith.truncf %13 : vector<16x32xf32> to vector<16x32xbf16>
    %c0_12 = arith.constant 0 : index
    %c0_13 = arith.constant 0 : index
    %15 = vector.load %arg9[%c0_12, %c0_13] : memref<16x32xbf16, #tpu.memory_space<vmem>>, vector<16x32xbf16>
    tpu.vector_store %arg9[%c0_12, %c0_13], %14 {strides = array<i32>} : memref<16x32xbf16, #tpu.memory_space<vmem>>, vector<16x32xbf16>,
    %c0_14 = arith.constant 0 : index
    %c0_15 = arith.constant 0 : index
    %16 = vector.load %arg4[%c0_14, %c0_15] : memref<32x32xbf16, #tpu.memory_space<vmem>>, vector<32x32xbf16>
    %cst_16 = arith.constant dense<0.000000e+00> : vector<16x32xf32>
    %17 = tpu.matmul %1, %16, %cst_16 {dimension_numbers = #tpu.dot_dimension_numbers<[1], [0], [0], [1], [0, 0, 1, 1], [], []>} : vector<16x32xbf16>, vector<32x32xbf16>, vector<16x32xf32> -> vector<16x32xf32>
    %c0_17 = arith.constant 0 : index
    %c0_18 = arith.constant 0 : index
    %18 = vector.load %arg7[%c0_17, %c0_18] : memref<1x32xf32, #tpu.memory_space<vmem>>, vector<1x32xf32>
    %19 = vector.broadcast %18 : vector<1x32xf32> to vector<16x32xf32>
    %20 = arith.addf %17, %19 : vector<16x32xf32>
    %21 = arith.truncf %20 : vector<16x32xf32> to vector<16x32xbf16>
    %c0_19 = arith.constant 0 : index
    %c0_20 = arith.constant 0 : index
    %22 = vector.load %arg10[%c0_19, %c0_20] : memref<16x32xbf16, #tpu.memory_space<vmem>>, vector<16x32xbf16>
    tpu.vector_store %arg10[%c0_19, %c0_20], %21 {strides = array<i32>} : memref<16x32xbf16, #tpu.memory_space<vmem>>, vector<16x32xbf16>,
    return
  }
  func.func @transform_0(%arg0: i32) -> (i32, i32) {
    %c0_i32 = arith.constant 0 : i32
    %c0_i32_0 = arith.constant 0 : i32
    return %arg0, %c0_i32 : i32, i32
  }
  func.func @transform_1(%arg0: i32) -> (i32, i32) {
    %c0_i32 = arith.constant 0 : i32
    %c0_i32_0 = arith.constant 0 : i32
    %c0_i32_1 = arith.constant 0 : i32
    return %c0_i32, %c0_i32_0 : i32, i32
  }
  func.func @transform_2(%arg0: i32) -> (i32, i32) {
    %c0_i32 = arith.constant 0 : i32
    %c0_i32_0 = arith.constant 0 : i32
    %c0_i32_1 = arith.constant 0 : i32
    return %c0_i32, %c0_i32_0 : i32, i32
  }
  func.func @transform_3(%arg0: i32) -> (i32, i32) {
    %c0_i32 = arith.constant 0 : i32
    %c0_i32_0 = arith.constant 0 : i32
    %c0_i32_1 = arith.constant 0 : i32
    return %c0_i32, %c0_i32_0 : i32, i32
  }
  func.func @transform_4(%arg0: i32) -> (i32, i32) {
    %c0_i32 = arith.constant 0 : i32
    %c0_i32_0 = arith.constant 0 : i32
    %c0_i32_1 = arith.constant 0 : i32
    return %c0_i32, %c0_i32_0 : i32, i32
  }
  func.func @transform_5(%arg0: i32) -> (i32, i32) {
    %c0_i32 = arith.constant 0 : i32
    %c0_i32_0 = arith.constant 0 : i32
    %c0_i32_1 = arith.constant 0 : i32
    return %c0_i32, %c0_i32_0 : i32, i32
  }
  func.func @transform_6(%arg0: i32) -> (i32, i32) {
    %c0_i32 = arith.constant 0 : i32
    %c0_i32_0 = arith.constant 0 : i32
    %c0_i32_1 = arith.constant 0 : i32
    return %c0_i32, %c0_i32_0 : i32, i32
  }
  func.func @transform_7(%arg0: i32) -> (i32, i32) {
    %c0_i32 = arith.constant 0 : i32
    %c0_i32_0 = arith.constant 0 : i32
    return %arg0, %c0_i32 : i32, i32
  }
  func.func @transform_8(%arg0: i32) -> (i32, i32) {
    %c0_i32 = arith.constant 0 : i32
    %c0_i32_0 = arith.constant 0 : i32
    return %arg0, %c0_i32 : i32, i32
  }
  func.func @transform_9(%arg0: i32) -> (i32, i32) {
    %c0_i32 = arith.constant 0 : i32
    %c0_i32_0 = arith.constant 0 : i32
    return %arg0, %c0_i32 : i32, i32
  }
}

</mosaic_0001>

<bundles_post_ra>
// kernel: tpu_custom_call.1
= control target key start
LH: loop header
LB: loop body
LE: loop exit
PB: predicated region body
PF: predicated region fallthrough
CT: control target
= control target key end

     0   :  { %15 = vsyncpa [#allocation3], 0  ;;  %s804_s0 = inlined_call_operand.hbm [shape: f32[16,32], index: 0, kind: input, shape index: {}]   ;;  %s805_s1 = inlined_call_operand.hbm [shape: bf16[32,32], index: 1, kind: input, shape index: {}]   ;;  %s806_s2 = inlined_call_operand.hbm [shape: bf16[32,32], index: 2, kind: input, shape index: {}]   ;;  %s807_s3 = inlined_call_operand.hbm [shape: bf16[32,32], index: 3, kind: input, shape index: {}]   ;;  %s808_s4 = inlined_call_operand.vmem [shape: f32[1,32], index: 4, kind: input, shape index: {}]   ;;  %s809_s5 = inlined_call_operand.vmem [shape: f32[1,32], index: 5, kind: input, shape index: {}]   ;;  %s810_s6 = inlined_call_operand.vmem [shape: f32[1,32], index: 6, kind: input, shape index: {}]   ;;  %s811_s7 = inlined_call_operand.hbm [shape: bf16[16,32], index: 7, kind: output, shape index: {0}]   ;;  %s812_s8 = inlined_call_operand.hbm [shape: bf16[16,32], index: 8, kind: output, shape index: {1}]   ;;  %s813_s9 = inlined_call_operand.hbm [shape: bf16[16,32], index: 9, kind: output, shape index: {2}]  }
   0x1   :  { %16 = vsyncpa [#allocation6], 0 }
   0x2   :  { %17 = vsyncpa [#allocation9], 0 }
   0x3   :  { %18 = vsyncpa [#allocation4], 0 }
   0x4   :  { %19 = vsyncpa [#allocation12], 0  ;;  %s607_s30 = smov [#allocation5]   ;;  %s443_s13 = scalar_lea.hbm %s805_s1, 256 }
   0x5   :  { %s37_s10 = sshll.u32 %s607_s30, 4  ;;  %p444_p0 = scmp.ne.s32.totalorder %s805_s1, %s443_s13  ;;  %s38_s10 = int_to_ptr.vmem [resolvable:$true] %s37_s10 }
   0x6   :  { %p447_p1 = scmp.lt.u32.totalorder %s443_s13, %s805_s1 }
   0x8   :  { %p449_p2 = pnand %p447_p1, %p444_p0 }
   0xa   :  { %452 = shalt.err (!%p449_p2)
}
   0xb   :  { %s453_s18 = scalar_lea.vmem %s38_s10, 256  ;;  %p458_p4 = scmp.lt.s32.totalorder %s38_s10, %s38_s10 }
   0xc   :  { %p454_p3 = scmp.ne.s32.totalorder %s38_s10, %s453_s18  ;;  %p459_p5 = scmp.lt.s32.totalorder %s453_s18, %s453_s18 }
   0xe   :  { %p460_p6 = por %p459_p5, %p458_p4 }
  0x10   :  { %p461_p7 = pnand %p460_p6, %p454_p3 }
  0x12   :  { %464 = shalt.err (!%p461_p7)
}
  0x13   :  { %s608_s19 = smov 64   ;;  %s609_s20 = smov 4  }
  0x14   :  { %43 = dma.hbm_to_vmem [thread:$0]  %s805_s1, 256, %s38_s10, [#allocation6], %s608_s19, %s608_s19, %s609_s20  }
  0x15   :  { %s610_s23 = smov [#allocation2]   ;;  %s465_s27 = scalar_lea.hbm %s804_s0, 256 }
  0x16   :  { %s25_s24 = sshll.u32 %s610_s23, 4  ;;  %p466_p8 = scmp.ne.s32.totalorder %s804_s0, %s465_s27  ;;  %s26_s24 = int_to_ptr.vmem [resolvable:$true] %s25_s24 }
  0x17   :  { %p469_p9 = scmp.lt.u32.totalorder %s465_s27, %s804_s0 }
  0x19   :  { %p471_p10 = pnand %p469_p9, %p466_p8 }
  0x1b   :  { %474 = shalt.err (!%p471_p10)
}
  0x1c   :  { %s475_s12 = scalar_lea.vmem %s26_s24, 256  ;;  %p480_p12 = scmp.lt.s32.totalorder %s26_s24, %s26_s24 }
  0x1d   :  { %p476_p11 = scmp.ne.s32.totalorder %s26_s24, %s475_s12  ;;  %p481_p13 = scmp.lt.s32.totalorder %s475_s12, %s475_s12 }
  0x1f   :  { %p482_p0 = por %p481_p13, %p480_p12 }
  0x21   :  { %p483_p1 = pnand %p482_p0, %p476_p11 }
  0x23   :  { %486 = shalt.err (!%p483_p1)
}
  0x24   :  { %s611_s1 = smov 128   ;;  %s612_s10 = smov 8  }
  0x25   :  { %31 = dma.hbm_to_vmem [thread:$0]  %s804_s0, 256, %s26_s24, [#allocation3], %s611_s1, %s611_s1, %s612_s10  }
  0x26   :  { %s613_s15 = smov [#allocation7]   ;;  %s614_s17 = smov [#allocation8]  }
  0x27   :  { %s49_s16 = sshll.u32 %s613_s15, 4  ;;  %s61_s18 = sshll.u32 %s614_s17, 4  ;;  %s50_s16 = int_to_ptr.vmem [resolvable:$true] %s49_s16  ;;  %s697_s18 = int_to_ptr.vmem [resolvable:$true] %s61_s18 }
  0x28   :  { %s487_s23 = scalar_lea.hbm %s806_s2, 256 }
  0x29   :  { %p488_p2 = scmp.ne.s32.totalorder %s806_s2, %s487_s23  ;;  %p491_p3 = scmp.lt.u32.totalorder %s487_s23, %s806_s2 }
  0x2b   :  { %p493_p4 = pnand %p491_p3, %p488_p2 }
  0x2d   :  { %496 = shalt.err (!%p493_p4)
}
  0x2e   :  { %s497_s0 = scalar_lea.vmem %s50_s16, 256  ;;  %p502_p6 = scmp.lt.s32.totalorder %s50_s16, %s50_s16 }
  0x2f   :  { %p498_p5 = scmp.ne.s32.totalorder %s50_s16, %s497_s0  ;;  %p503_p7 = scmp.lt.s32.totalorder %s497_s0, %s497_s0 }
  0x31   :  { %p504_p8 = por %p503_p7, %p502_p6 }
  0x33   :  { %p505_p9 = pnand %p504_p8, %p498_p5 }
  0x35   :  { %508 = shalt.err (!%p505_p9)
}
  0x36   :  { %55 = dma.hbm_to_vmem [thread:$0]  %s806_s2, 256, %s50_s16, [#allocation6], %s608_s19, %s608_s19, %s609_s20  }
  0x37   :  { %s509_s12 = scalar_lea.hbm %s807_s3, 256 }
  0x38   :  { %p510_p10 = scmp.ne.s32.totalorder %s807_s3, %s509_s12  ;;  %p513_p11 = scmp.lt.u32.totalorder %s509_s12, %s807_s3 }
  0x3a   :  { %p515_p12 = pnand %p513_p11, %p510_p10 }
  0x3c   :  { %518 = shalt.err (!%p515_p12)
}
  0x3d   :  { %s519_s15 = scalar_lea.vmem %s697_s18, 256  ;;  %p524_p0 = scmp.lt.s32.totalorder %s697_s18, %s697_s18 }
  0x3e   :  { %p520_p13 = scmp.ne.s32.totalorder %s697_s18, %s519_s15  ;;  %p525_p1 = scmp.lt.s32.totalorder %s519_s15, %s519_s15 }
  0x40   :  { %p526_p2 = por %p525_p1, %p524_p0 }
  0x42   :  { %p527_p3 = pnand %p526_p2, %p520_p13 }
  0x44   :  { %530 = shalt.err (!%p527_p3)
}
  0x45   :  { %67 = dma.hbm_to_vmem [thread:$0]  %s807_s3, 256, %s697_s18, [#allocation9], %s608_s19, %s608_s19, %s609_s20  }
  0x46   :  { %597 = dma.done.wait [#allocation3], 256  }
  0x47   :  { %598 = vsyncadd [#allocation3], 4294967040 }
  0x48   :  { %599 = dma.done.wait [#allocation6], 512  }
  0x49   :  { %600 = vsyncadd [#allocation6], 4294966784 }
  0x4a   :  { %601 = dma.done.wait [#allocation9], 256  }
  0x4b   :  { %602 = vsyncadd [#allocation9], 4294967040  ;;  %v615_v0 = vmov 0.0   ;;  %vm616_vm0 = vmmov 0   ;;  %v437_v1 = vld [vmem:[#allocation5] sm:$0xff]   ;;  %v438_v2 = vld [vmem:[#allocation5 + $0x8] sm:$0xff]  }
  0x4c   :  { %400 = vmatprep.subr.bf16.mxu0 %v615_v0  ;;  %408 = vmatprep.subr.bf16.mxu1 %v615_v0  ;;  %v439_v3 = vld [vmem:[#allocation7] sm:$0xff]   ;;  %v88_v5 = vld [vmem:[#allocation2 + $0x8] sm:$0xff]  ;;  %vm113_vm1 = vcmask 261120   ;;  %v440_v8 = vld [vmem:[#allocation8] sm:$0xff]   ;;  %vm166_vm2 = vcmask 257024   ;;  %s617_s22 = smov [#allocation10]  }
  0x4d   :  { %404 = vmatprep.mubr.msk.bf16.mxu0 %vm616_vm0, %v615_v0  ;;  %412 = vmatprep.mubr.msk.bf16.mxu1 %vm616_vm0, %v615_v0  ;;  %v87_v4 = vld [vmem:[#allocation2] sm:$0xff]  ;;  %v441_v7 = vld [vmem:[#allocation7 + $0x8] sm:$0xff]   ;;  %v442_v9 = vld [vmem:[#allocation8 + $0x8] sm:$0xff]   ;;  %s322_s23 = sshll.u32 %s617_s22, 4  ;;  %s618_s25 = smov [#allocation11]   ;;  %s323_s23 = int_to_ptr.vmem [resolvable:$true] %s322_s23 }
  0x4e   :  { %401 = vmatpush3.bf16.msra.mxu0 %v437_v1  ;;  %409 = vmatpush3.bf16.msra.mxu1 %v439_v3  ;;  %v89_v6 = vpack.c.bf16 %v88_v5, %v87_v4  ;;  %v367_v10 = vld [vmem:[%s808_s4] ss:$0 sm:$0xff]  ;;  %s334_s4 = sshll.u32 %s618_s25, 4  ;;  %s531_s27 = scalar_lea.vmem %s323_s23, 128  ;;  %s749_s4 = int_to_ptr.vmem [resolvable:$true] %s334_s4 }
  0x4f   :  { %402 = vmatprep.subr.bf16.mxu0 %v615_v0  ;;  %410 = vmatprep.subr.bf16.mxu1 %v615_v0  ;;  %v373_v12 = vld [vmem:[%s809_s5] ss:$0 sm:$0xff]  ;;  %p532_p4 = scmp.ne.s32.totalorder %s323_s23, %s531_s27  ;;  %p536_p5 = scmp.lt.s32.totalorder %s323_s23, %s323_s23 }
  0x50   :  { %v379_v27 = vld [vmem:[%s810_s6] ss:$0 sm:$0xff]  ;;  %p537_p6 = scmp.lt.s32.totalorder %s531_s27, %s531_s27 }
  0x52   :  { %403 = vmatpush3.bf16.msra.mxu0 %v438_v2  ;;  %411 = vmatpush3.bf16.msra.mxu1 %v441_v7  ;;  %p538_p7 = por %p537_p6, %p536_p5 }
  0x53   :  { %416 = vmatprep.subr.bf16.mxu0 %v615_v0 }
  0x54   :  { %p539_p8 = pnand %p538_p7, %p532_p4 }
  0x55   :  { %405 = vmatmul.mubr.msk.bf16.vlgmr.msra.gmra.mrb[0].mxu0 %vm113_vm1, %v89_v6  ;;  %413 = vmatmul.mubr.msk.bf16.vlgmr.msra.gmra.mrb[0].mxu1 %vm113_vm1, %v89_v6 }
  0x56   :  { %417 = vmatpush3.bf16.msra.mxu0 %v440_v8  ;;  %420 = vmatprep.mubr.msk.bf16.mxu0 %vm616_vm0, %v615_v0 }
  0x57   :  { %418 = vmatprep.subr.bf16.mxu0 %v615_v0 }
  0x5a   :  { %419 = vmatpush3.bf16.msra.mxu0 %v442_v9 }
  0x5d   :  { %421 = vmatmul.mubr.msk.bf16.vlgmr.msra.gmra.mrb[4].mxu0 %vm113_vm1, %v89_v6 }
 0x128   :  { %v151_v11 = vpop.f32.mrb[0].mxu0  ;;  %v226_v16 = vpop.f32.mrb[0].mxu1 }
 0x129   :  { %v152_v13 = vadd.f32 %v367_v10, %v151_v11  ;;  %v406_v14 = vpop.f32.mrb[1].mxu0  ;;  %v227_v20 = vadd.f32 %v373_v12, %v226_v16  ;;  %v414_v21 = vpop.f32.mrb[1].mxu1 }
 0x12a   :  { %v154_v15 = vpop.f32.mrb[2].mxu0  ;;  %v229_v22 = vpop.f32.mrb[2].mxu1 }
 0x12b   :  { %v385_v17 = vpack.c.bf16 %v152_v13, %v152_v13  ;;  %v155_v18 = vadd.f32 %v367_v10, %v154_v15  ;;  %v407_v19 = vpop.f32.mrb[3].mxu0  ;;  %v387_v24 = vpack.c.bf16 %v227_v20, %v227_v20  ;;  %v230_v25 = vadd.f32 %v373_v12, %v229_v22  ;;  %v415_v26 = vpop.f32.mrb[3].mxu1 }
 0x12d   :  { %v386_v23 = vpack.c.bf16 %v155_v18, %v155_v18  ;;  %167 = vst.msk [vmem:[#allocation10] sm:$0xf] %vm166_vm2, %v385_v17  ;;  %v388_v28 = vpack.c.bf16 %v230_v25, %v230_v25  ;;  %241 = vst.msk [vmem:[#allocation11] sm:$0xf] %vm166_vm2, %v387_v24 }
 0x12f   :  { %168 = vst.msk [vmem:[#allocation10 + $0x4] sm:$0xf] %vm166_vm2, %v386_v23 }
 0x130   :  { %v300_v29 = vpop.f32.mrb[4].mxu0 }
 0x131   :  { %542 = shalt.err (!%p539_p8)
}
 0x132   :  { %s543_s24 = scalar_lea.hbm %s811_s7, 128 }
 0x133   :  { %p544_p9 = scmp.ne.s32.totalorder %s811_s7, %s543_s24  ;;  %p547_p10 = scmp.lt.u32.totalorder %s543_s24, %s811_s7 }
 0x135   :  { %p549_p11 = pnand %p547_p10, %p544_p9 }
 0x137   :  { %552 = shalt.err (!%p549_p11)
}
 0x138   :  { %328 = dma.vmem_to_hbm [thread:$0]  %s323_s23, 128, %s811_s7, [#allocation4], %s608_s19, %s608_s19, %s609_s20   ;;  %v301_v30 = vadd.f32 %v379_v27, %v300_v29  ;;  %242 = vst.msk [vmem:[#allocation11 + $0x4] sm:$0xf] %vm166_vm2, %v388_v28  ;;  %v422_v31 = vpop.f32.mrb[5].mxu0 }
 0x139   :  { %s619_s10 = smov [#allocation13]   ;;  %v303_v32 = vpop.f32.mrb[6].mxu0  ;;  %s553_s14 = scalar_lea.vmem %s749_s4, 128 }
 0x13a   :  { %s346_s13 = sshll.u32 %s619_s10, 4  ;;  %p554_p12 = scmp.ne.s32.totalorder %s749_s4, %s553_s14  ;;  %s347_s13 = int_to_ptr.vmem [resolvable:$true] %s346_s13 }
 0x13b   :  { %p558_p13 = scmp.lt.s32.totalorder %s749_s4, %s749_s4  ;;  %p559_p0 = scmp.lt.s32.totalorder %s553_s14, %s553_s14 }
 0x13d   :  { %p560_p1 = por %p559_p0, %p558_p13 }
 0x13f   :  { %p561_p2 = pnand %p560_p1, %p554_p12 }
 0x141   :  { %564 = shalt.err (!%p561_p2)
}
 0x142   :  { %s565_s16 = scalar_lea.hbm %s812_s8, 128 }
 0x143   :  { %p566_p3 = scmp.ne.s32.totalorder %s812_s8, %s565_s16  ;;  %p569_p4 = scmp.lt.u32.totalorder %s565_s16, %s812_s8 }
 0x145   :  { %p571_p5 = pnand %p569_p4, %p566_p3 }
 0x147   :  { %574 = shalt.err (!%p571_p5)
}
 0x148   :  { %340 = dma.vmem_to_hbm [thread:$0]  %s749_s4, 128, %s812_s8, [#allocation12], %s608_s19, %s608_s19, %s609_s20   ;;  %v389_v33 = vpack.c.bf16 %v301_v30, %v301_v30  ;;  %v304_v34 = vadd.f32 %v379_v27, %v303_v32  ;;  %v423_v35 = vpop.f32.mrb[7].mxu0 }
 0x149   :  { %s575_s23 = scalar_lea.vmem %s347_s13, 128  ;;  %p580_p7 = scmp.lt.s32.totalorder %s347_s13, %s347_s13 }
 0x14a   :  { %315 = vst.msk [vmem:[#allocation13] sm:$0xf] %vm166_vm2, %v389_v33  ;;  %v390_v36 = vpack.c.bf16 %v304_v34, %v304_v34  ;;  %p576_p6 = scmp.ne.s32.totalorder %s347_s13, %s575_s23  ;;  %p581_p8 = scmp.lt.s32.totalorder %s575_s23, %s575_s23 }
 0x14c   :  { %316 = vst.msk [vmem:[#allocation13 + $0x4] sm:$0xf] %vm166_vm2, %v390_v36  ;;  %p582_p9 = por %p581_p8, %p580_p7 }
 0x14e   :  { %p583_p10 = pnand %p582_p9, %p576_p6 }
 0x150   :  { %586 = shalt.err (!%p583_p10)
}
 0x151   :  { %s587_s8 = scalar_lea.hbm %s813_s9, 128 }
 0x152   :  { %p588_p11 = scmp.ne.s32.totalorder %s813_s9, %s587_s8  ;;  %p591_p12 = scmp.lt.u32.totalorder %s587_s8, %s813_s9 }
 0x154   :  { %p593_p13 = pnand %p591_p12, %p588_p11 }
 0x156   :  { %596 = shalt.err (!%p593_p13)
}
 0x157   :  { %352 = dma.vmem_to_hbm [thread:$0]  %s347_s13, 128, %s813_s9, [#allocation12], %s608_s19, %s608_s19, %s609_s20  }
 0x158   :  { %603 = dma.done.wait [#allocation4], 128  }
 0x159   :  { %604 = vsyncadd [#allocation4], 4294967168 }
 0x15a   :  { %605 = dma.done.wait [#allocation12], 256  }
 0x15b   :  { %606 = vsyncadd [#allocation12], 4294967040 }
 0x15c   :  { %362 = vsyncpa [#allocation3], 1 }
 0x15d   :  { %363 = vsyncpa [#allocation6], 1 }
 0x15e   :  { %364 = vsyncpa [#allocation9], 1 }
 0x15f   :  { %365 = vsyncpa [#allocation4], 1 }
 0x160   :  { %366 = vsyncpa [#allocation12], 1 }

</bundles_post_ra>
